<compile_context>
chip_gen: v5e
topology: v5e:2x2
jax: 0.10.0
libtpu: 0.0.40
codegen_flags: <defaults>
</compile_context>

<pallas_src>
import functools

import jax
import jax.numpy as jnp
from jax.experimental import pallas as pl
from jax.experimental.pallas import tpu as pltpu


def _mlp_kernel(x_ref, w1_ref, b1_ref, w2_ref, b2_ref, w3_ref, b3_ref, o_ref):
    # fc1 -> relu -> fc2 -> relu -> fc3 -> sigmoid, fused in one kernel.
    # MXU operands are bf16, accumulation is f32 (preferred_element_type);
    # bias add / ReLU / sigmoid run in f32; activations drop to bf16 right
    # after each ReLU so only the half-width copy stays live.
    x = x_ref[...]  # bf16 batch tile

    h1 = jnp.dot(x, w1_ref[...], preferred_element_type=jnp.float32) + b1_ref[...]
    h1 = jnp.maximum(h1, 0.0).astype(jnp.bfloat16)

    h2 = jnp.dot(h1, w2_ref[...], preferred_element_type=jnp.float32) + b2_ref[...]
    h2 = jnp.maximum(h2, 0.0).astype(jnp.bfloat16)

    logits = jnp.dot(h2, w3_ref[...], preferred_element_type=jnp.float32) + b3_ref[...]
    o_ref[...] = jax.nn.sigmoid(logits).astype(o_ref.dtype)  # bf16 writeback


def _round_up(x, m):
    return pl.cdiv(x, m) * m


@functools.partial(jax.jit, static_argnames=("block_b",))
def mlp_forward(x, w1, b1, w2, b2, w3, b3, *, block_b=1024):
    # Flatten like torch: x.view(B, -1).  (torch's x.float() followed by a bf16 MXU
    # cast is equivalent to casting straight to bf16 — no f32 intermediate copy.)
    B = x.shape[0]
    x2d = jnp.reshape(x, (B, -1)).astype(jnp.bfloat16)
    feat = x2d.shape[1]
    h1, h2, nc = w1.shape[1], w2.shape[1], w3.shape[1]

    # Lane-dense output: pad num_class up to a multiple of 128.
    nc_p = _round_up(nc, 128)

    # Sublane-dense batch: pad B up to a multiple of 8.  When the batch is big
    # enough to split, aim for >=2 tiles so the "parallel" grid axis can shard
    # across both TensorCores on v7x (single-TC chips are unaffected).
    b_p = _round_up(B, 8)
    if b_p >= 16:
        tb = min(block_b, _round_up(pl.cdiv(b_p, 2), 8))
    else:
        tb = b_p
    b_p = _round_up(b_p, tb)
    nb = b_p // tb

    # Only materialize a padded copy of x when padding is actually needed.
    if b_p == B:
        x_p = x2d
    else:
        x_p = jnp.zeros((b_p, feat), jnp.bfloat16).at[:B].set(x2d)

    # bf16 operands for the MXU (weights + x); biases stay f32.
    w1_b = w1.astype(jnp.bfloat16)
    w2_b = w2.astype(jnp.bfloat16)
    w3_p = jnp.zeros((h2, nc_p), jnp.bfloat16).at[:, :nc].set(w3.astype(jnp.bfloat16))
    b3_p = jnp.zeros((1, nc_p), jnp.float32).at[:, :nc].set(b3.astype(jnp.float32))

    flops = 2 * b_p * (feat * h1 + h1 * h2 + h2 * nc_p)
    bytes_accessed = (
        b_p * feat * 2                                   # x (bf16)
        + (feat * h1 + h1 * h2 + h2 * nc_p) * 2          # weights (bf16, DMA'd once)
        + (h1 + h2 + nc_p) * 4                           # biases (f32)
        + b_p * nc_p * 2                                 # output (bf16)
    )
    transcendentals = 2 * b_p * nc_p                     # sigmoid ~ exp + reciprocal

    out_p = pl.pallas_call(
        _mlp_kernel,
        out_shape=jax.ShapeDtypeStruct((b_p, nc_p), jnp.bfloat16),
        grid_spec=pltpu.PrefetchScalarGridSpec(
            num_scalar_prefetch=0,
            grid=(nb,),
            in_specs=[
                pl.BlockSpec((tb, feat), lambda i: (i, 0)),      # x: tiled over batch
                pl.BlockSpec((feat, h1), lambda i: (0, 0)),      # weights: constant block
                pl.BlockSpec((1, h1), lambda i: (0, 0)),         #  -> DMA'd once, reused
                pl.BlockSpec((h1, h2), lambda i: (0, 0)),
                pl.BlockSpec((1, h2), lambda i: (0, 0)),
                pl.BlockSpec((h2, nc_p), lambda i: (0, 0)),
                pl.BlockSpec((1, nc_p), lambda i: (0, 0)),
            ],
            out_specs=pl.BlockSpec((tb, nc_p), lambda i: (i, 0)),
        ),
        compiler_params=pltpu.CompilerParams(
            dimension_semantics=("parallel",)),
        cost_estimate=pl.CostEstimate(
            flops=flops,
            transcendentals=transcendentals,
            bytes_accessed=bytes_accessed),
    )(x_p, w1_b, b1, w2_b, b2, w3_p, b3_p)

    # Strip batch / class padding and return f32 like the torch reference.
    return out_p[:B, :nc].astype(jnp.float32)


def _linear_init(key, fan_in, fan_out):
    # Deterministic init mimicking torch.nn.Linear default: U(-1/sqrt(fan_in), 1/sqrt(fan_in))
    kw, kb = jax.random.split(key)
    bound = 1.0 / jnp.sqrt(jnp.float32(fan_in))
    w = jax.random.uniform(kw, (fan_in, fan_out), jnp.float32, -bound, bound)
    b = jax.random.uniform(kb, (1, fan_out), jnp.float32, -bound, bound)
    return w, b


if __name__ == "__main__":
    # Small shapes consistent with the module: x.view(B, -1) -> featureDim
    B, C, H, W = 2, 4, 4, 4          # featureDim = 4*4*4 = 64
    feature_dim = C * H * W
    num_class = 10

    key = jax.random.PRNGKey(0)
    kx, k1, k2, k3 = jax.random.split(key, 4)

    x = jax.random.normal(kx, (B, C, H, W), jnp.float32)
    w1, b1 = _linear_init(k1, feature_dim, 256)
    w2, b2 = _linear_init(k2, 256, 128)
    w3, b3 = _linear_init(k3, 128, num_class)

    out = mlp_forward(x, w1, b1, w2, b2, w3, b3)
    jax.block_until_ready(out)

    # sanity: shape and sigmoid range
    assert out.shape == (B, num_class)
    assert bool(jnp.all((out >= 0.0) & (out <= 1.0)))

    print("KERNEL_OK")
</pallas_src>

<mosaic_0001>
module attributes {stable_mosaic.version = 11 : i64} {
  func.func @_mlp_kernel(%arg0: i32, %arg1: memref<8x64xbf16, #tpu.memory_space<vmem>>, %arg2: memref<64x256xbf16, #tpu.memory_space<vmem>>, %arg3: memref<1x256xf32, #tpu.memory_space<vmem>>, %arg4: memref<256x128xbf16, #tpu.memory_space<vmem>>, %arg5: memref<1x128xf32, #tpu.memory_space<vmem>>, %arg6: memref<128x128xbf16, #tpu.memory_space<vmem>>, %arg7: memref<1x128xf32, #tpu.memory_space<vmem>>, %arg8: memref<8x128xbf16, #tpu.memory_space<vmem>>) attributes {dimension_semantics = [#tpu.dimension_semantics<parallel>], iteration_bounds = array<i64: 1>, scalar_prefetch = 0 : i64, scratch_operands = 0 : i64, tpu.core_type = #tpu.core_type<tc>, window_params = [{transform_indices = @transform_0, window_bounds = array<i64: 8, 64>}, {pipeline_mode = #tpu.pipeline_mode<synchronous>, transform_indices = @transform_1, window_bounds = array<i64: 64, 256>}, {pipeline_mode = #tpu.pipeline_mode<synchronous>, transform_indices = @transform_2, window_bounds = array<i64: 1, 256>}, {pipeline_mode = #tpu.pipeline_mode<synchronous>, transform_indices = @transform_3, window_bounds = array<i64: 256, 128>}, {pipeline_mode = #tpu.pipeline_mode<synchronous>, transform_indices = @transform_4, window_bounds = array<i64: 1, 128>}, {pipeline_mode = #tpu.pipeline_mode<synchronous>, transform_indices = @transform_5, window_bounds = array<i64: 128, 128>}, {pipeline_mode = #tpu.pipeline_mode<synchronous>, transform_indices = @transform_6, window_bounds = array<i64: 1, 128>}, {transform_indices = @transform_7, window_bounds = array<i64: 8, 128>}]} {
    %c0 = arith.constant 0 : index
    %c0_0 = arith.constant 0 : index
    %0 = vector.load %arg1[%c0, %c0_0] : memref<8x64xbf16, #tpu.memory_space<vmem>>, vector<8x64xbf16>
    %c0_1 = arith.constant 0 : index
    %c0_2 = arith.constant 0 : index
    %1 = vector.load %arg2[%c0_1, %c0_2] : memref<64x256xbf16, #tpu.memory_space<vmem>>, vector<64x256xbf16>
    %cst = arith.constant dense<0.000000e+00> : vector<8x256xf32>
    %2 = tpu.matmul %0, %1, %cst {dimension_numbers = #tpu.dot_dimension_numbers<[1], [0], [0], [1], [0, 0, 1, 1], [], []>} : vector<8x64xbf16>, vector<64x256xbf16>, vector<8x256xf32> -> vector<8x256xf32>
    %c0_3 = arith.constant 0 : index
    %c0_4 = arith.constant 0 : index
    %3 = vector.load %arg3[%c0_3, %c0_4] : memref<1x256xf32, #tpu.memory_space<vmem>>, vector<1x256xf32>
    %4 = vector.broadcast %3 : vector<1x256xf32> to vector<8x256xf32>
    %5 = arith.addf %2, %4 : vector<8x256xf32>
    %cst_5 = arith.constant 0.000000e+00 : f32
    %6 = vector.broadcast %cst_5 : f32 to vector<8x256xf32>
    %7 = arith.maximumf %5, %6 : vector<8x256xf32>
    %8 = arith.truncf %7 : vector<8x256xf32> to vector<8x256xbf16>
    %c0_6 = arith.constant 0 : index
    %c0_7 = arith.constant 0 : index
    %9 = vector.load %arg4[%c0_6, %c0_7] : memref<256x128xbf16, #tpu.memory_space<vmem>>, vector<256x128xbf16>
    %cst_8 = arith.constant dense<0.000000e+00> : vector<8x128xf32>
    %10 = tpu.matmul %8, %9, %cst_8 {dimension_numbers = #tpu.dot_dimension_numbers<[1], [0], [0], [1], [0, 0, 1, 1], [], []>} : vector<8x256xbf16>, vector<256x128xbf16>, vector<8x128xf32> -> vector<8x128xf32>
    %c0_9 = arith.constant 0 : index
    %c0_10 = arith.constant 0 : index
    %11 = vector.load %arg5[%c0_9, %c0_10] : memref<1x128xf32, #tpu.memory_space<vmem>>, vector<1x128xf32>
    %12 = vector.broadcast %11 : vector<1x128xf32> to vector<8x128xf32>
    %13 = arith.addf %10, %12 : vector<8x128xf32>
    %cst_11 = arith.constant 0.000000e+00 : f32
    %14 = vector.broadcast %cst_11 : f32 to vector<8x128xf32>
    %15 = arith.maximumf %13, %14 : vector<8x128xf32>
    %16 = arith.truncf %15 : vector<8x128xf32> to vector<8x128xbf16>
    %c0_12 = arith.constant 0 : index
    %c0_13 = arith.constant 0 : index
    %17 = vector.load %arg6[%c0_12, %c0_13] : memref<128x128xbf16, #tpu.memory_space<vmem>>, vector<128x128xbf16>
    %cst_14 = arith.constant dense<0.000000e+00> : vector<8x128xf32>
    %18 = tpu.matmul %16, %17, %cst_14 {dimension_numbers = #tpu.dot_dimension_numbers<[1], [0], [0], [1], [0, 0, 1, 1], [], []>} : vector<8x128xbf16>, vector<128x128xbf16>, vector<8x128xf32> -> vector<8x128xf32>
    %c0_15 = arith.constant 0 : index
    %c0_16 = arith.constant 0 : index
    %19 = vector.load %arg7[%c0_15, %c0_16] : memref<1x128xf32, #tpu.memory_space<vmem>>, vector<1x128xf32>
    %20 = vector.broadcast %19 : vector<1x128xf32> to vector<8x128xf32>
    %21 = arith.addf %18, %20 : vector<8x128xf32>
    %22 = arith.negf %21 : vector<8x128xf32>
    %23 = math.exp %22 : vector<8x128xf32>
    %cst_17 = arith.constant 1.000000e+00 : f32
    %24 = vector.broadcast %cst_17 : f32 to vector<8x128xf32>
    %25 = arith.addf %24, %23 : vector<8x128xf32>
    %26 = arith.divf %24, %25 : vector<8x128xf32>
    %27 = arith.truncf %26 : vector<8x128xf32> to vector<8x128xbf16>
    %c0_18 = arith.constant 0 : index
    %c0_19 = arith.constant 0 : index
    %28 = vector.load %arg8[%c0_18, %c0_19] : memref<8x128xbf16, #tpu.memory_space<vmem>>, vector<8x128xbf16>
    tpu.vector_store %arg8[%c0_18, %c0_19], %27 {strides = array<i32>} : memref<8x128xbf16, #tpu.memory_space<vmem>>, vector<8x128xbf16>,
    return
  }
  func.func @transform_0(%arg0: i32) -> (i32, i32) {
    %c0_i32 = arith.constant 0 : i32
    %c0_i32_0 = arith.constant 0 : i32
    return %arg0, %c0_i32 : i32, i32
  }
  func.func @transform_1(%arg0: i32) -> (i32, i32) {
    %c0_i32 = arith.constant 0 : i32
    %c0_i32_0 = arith.constant 0 : i32
    %c0_i32_1 = arith.constant 0 : i32
    return %c0_i32, %c0_i32_0 : i32, i32
  }
  func.func @transform_2(%arg0: i32) -> (i32, i32) {
    %c0_i32 = arith.constant 0 : i32
    %c0_i32_0 = arith.constant 0 : i32
    %c0_i32_1 = arith.constant 0 : i32
    return %c0_i32, %c0_i32_0 : i32, i32
  }
  func.func @transform_3(%arg0: i32) -> (i32, i32) {
    %c0_i32 = arith.constant 0 : i32
    %c0_i32_0 = arith.constant 0 : i32
    %c0_i32_1 = arith.constant 0 : i32
    return %c0_i32, %c0_i32_0 : i32, i32
  }
  func.func @transform_4(%arg0: i32) -> (i32, i32) {
    %c0_i32 = arith.constant 0 : i32
    %c0_i32_0 = arith.constant 0 : i32
    %c0_i32_1 = arith.constant 0 : i32
    return %c0_i32, %c0_i32_0 : i32, i32
  }
  func.func @transform_5(%arg0: i32) -> (i32, i32) {
    %c0_i32 = arith.constant 0 : i32
    %c0_i32_0 = arith.constant 0 : i32
    %c0_i32_1 = arith.constant 0 : i32
    return %c0_i32, %c0_i32_0 : i32, i32
  }
  func.func @transform_6(%arg0: i32) -> (i32, i32) {
    %c0_i32 = arith.constant 0 : i32
    %c0_i32_0 = arith.constant 0 : i32
    %c0_i32_1 = arith.constant 0 : i32
    return %c0_i32, %c0_i32_0 : i32, i32
  }
  func.func @transform_7(%arg0: i32) -> (i32, i32) {
    %c0_i32 = arith.constant 0 : i32
    %c0_i32_0 = arith.constant 0 : i32
    return %arg0, %c0_i32 : i32, i32
  }
}

</mosaic_0001>

<bundles_post_ra>
// kernel: mlp_forward.1
= control target key start
LH: loop header
LB: loop body
LE: loop exit
PB: predicated region body
PF: predicated region fallthrough
CT: control target
= control target key end

     0   :  { %vm82_vm0 = vcmask 523264   ;;  %s728_s1 = inlined_call_operand.vmem [shape: bf16[64,256], index: 1, kind: input, shape index: {}]   ;;  %s729_s3 = inlined_call_operand.vmem [shape: bf16[256,128], index: 3, kind: input, shape index: {}]   ;;  %s730_s0 = inlined_call_operand.vmem [shape: bf16[8,64], index: 0, kind: input, shape index: {}]   ;;  %s731_s4 = inlined_call_operand.vmem [shape: f32[1,128], index: 4, kind: input, shape index: {}]   ;;  %s732_s5 = inlined_call_operand.vmem [shape: bf16[128,128], index: 5, kind: input, shape index: {}]   ;;  %s733_s2 = inlined_call_operand.vmem [shape: f32[1,256], index: 2, kind: input, shape index: {}]   ;;  %s734_s6 = inlined_call_operand.vmem [shape: f32[1,128], index: 6, kind: input, shape index: {}]   ;;  %s735_s7 = inlined_call_operand.vmem [shape: bf16[8,128], index: 7, kind: output, shape index: {}]  }
   0x1   :  { %v408_v0 = vld [vmem:[%s728_s1 + $0x30] sm:$0xf]  ;;  %v520_v1 = vld [vmem:[%s728_s1 + $0x34] sm:$0xf0]  ;;  %v400_v2 = vld [vmem:[%s728_s1 + $0x20] sm:$0xf] }
   0x2   :  { %v409_v3 = vor.u32 %v520_v1, %v408_v0  ;;  %v518_v4 = vld [vmem:[%s728_s1 + $0x24] sm:$0xf0]  ;;  %v392_v6 = vld [vmem:[%s728_s1 + $0x10] sm:$0xf]  ;;  %v516_v7 = vld [vmem:[%s728_s1 + $0x14] sm:$0xf0] }
   0x3   :  { %v401_v5 = vor.u32 %v518_v4, %v400_v2  ;;  %v528_v8 = vld [vmem:[%s729_s3 + $0x38] sm:$0xff]  ;;  %v393_v9 = vor.u32 %v516_v7, %v392_v6  ;;  %v527_v10 = vld [vmem:[%s729_s3 + $0x30] sm:$0xff]  ;;  %v384_v12 = vld [vmem:[%s728_s1] sm:$0xf] }
   0x4   :  { %90 = vmatpush.bf16.msra.mxu1 %v409_v3  ;;  %248 = vmatpush.bf16.msra.mxu2 %v528_v8  ;;  %v536_v11 = vld [vmem:[%s729_s3 + $0x78] sm:$0xff]  ;;  %v514_v13 = vld [vmem:[%s728_s1 + $0x4] sm:$0xf0]  ;;  %v519_v14 = vld [vmem:[%s728_s1 + $0x34] sm:$0xf] }
   0x5   :  { %v410_v15 = vld [vmem:[%s728_s1 + $0x38] sm:$0xf0]  ;;  %261 = vmatpush.bf16.msra.mxu3 %v536_v11  ;;  %v535_v16 = vld [vmem:[%s729_s3 + $0x70] sm:$0xff]  ;;  %v385_v17 = vor.u32 %v514_v13, %v384_v12  ;;  %v526_v18 = vld [vmem:[%s729_s3 + $0x28] sm:$0xff] }
   0x6   :  { %v413_v19 = vor.u32 %v519_v14, %v410_v15  ;;  %v517_v20 = vld [vmem:[%s728_s1 + $0x24] sm:$0xf]  ;;  %v402_v21 = vld [vmem:[%s728_s1 + $0x28] sm:$0xf0]  ;;  %v27_v22 = vld [vmem:[%s730_s0] sm:$0xf] }
   0x7   :  { %v525_v23 = vld [vmem:[%s729_s3 + $0x20] sm:$0xff]  ;;  %v405_v24 = vor.u32 %v517_v20, %v402_v21  ;;  %v515_v25 = vld [vmem:[%s728_s1 + $0x14] sm:$0xf]  ;;  %v394_v26 = vld [vmem:[%s728_s1 + $0x18] sm:$0xf0] }
   0x8   :  { %91 = vmatpush.bf16.msra.mxu1 %v401_v5  ;;  %249 = vmatpush.bf16.msra.mxu2 %v527_v10  ;;  %v524_v27 = vld [vmem:[%s729_s3 + $0x18] sm:$0xff]  ;;  %v397_v28 = vor.u32 %v515_v25, %v394_v26  ;;  %v513_v29 = vld [vmem:[%s728_s1 + $0x4] sm:$0xf]  ;;  %v386_v30 = vld [vmem:[%s728_s1 + $0x8] sm:$0xf0] }
   0x9   :  { %262 = vmatpush.bf16.msra.mxu3 %v535_v16  ;;  %v523_v31 = vld [vmem:[%s729_s3 + $0x10] sm:$0xff]  ;;  %v389_v32 = vor.u32 %v513_v29, %v386_v30  ;;  %v522_v33 = vld [vmem:[%s729_s3 + $0x8] sm:$0xff]  ;;  %v521_v35 = vld [vmem:[%s729_s3] sm:$0xff] }
   0xa   :  { %v534_v34 = vld [vmem:[%s729_s3 + $0x68] sm:$0xff]  ;;  %v533_v36 = vld [vmem:[%s729_s3 + $0x60] sm:$0xff]  ;;  %v532_v37 = vld [vmem:[%s729_s3 + $0x58] sm:$0xff] }
   0xb   :  { %v531_v38 = vld [vmem:[%s729_s3 + $0x50] sm:$0xff]  ;;  %v530_v39 = vld [vmem:[%s729_s3 + $0x48] sm:$0xff]  ;;  %v529_v40 = vld [vmem:[%s729_s3 + $0x40] sm:$0xff] }
   0xc   :  { %92 = vmatpush.bf16.msra.mxu1 %v393_v9  ;;  %250 = vmatpush.bf16.msra.mxu2 %v526_v18  ;;  %v544_v41 = vld [vmem:[%s732_s5 + $0x38] sm:$0xff]  ;;  %v36_v42 = vld [vmem:[%s733_s2] sm:$0x3]  ;;  %v543_v43 = vld [vmem:[%s732_s5 + $0x30] sm:$0xff] }
   0xd   :  { %263 = vmatpush.bf16.msra.mxu3 %v534_v34  ;;  %344 = vmatpush.bf16.msra.mxu0 %v544_v41  ;;  %v38_v44 = vperm.slane %v36_v42, 0  ;;  %v39_v50 = vperm.slane %v36_v42, 1  ;;  %v542_v56 = vld [vmem:[%s732_s5 + $0x28] sm:$0xff]  ;;  %v541_v57 = vld [vmem:[%s732_s5 + $0x20] sm:$0xff]  ;;  %v540_v58 = vld [vmem:[%s732_s5 + $0x18] sm:$0xff] }
   0xe   :  { %v539_v59 = vld [vmem:[%s732_s5 + $0x10] sm:$0xff]  ;;  %v538_v60 = vld [vmem:[%s732_s5 + $0x8] sm:$0xff]  ;;  %v537_v61 = vld [vmem:[%s732_s5] sm:$0xff] }
   0xf   :  { %v545_v0 = vld [vmem:[%s731_s4] ss:$0 sm:$0xff] }
  0x10   :  { %93 = vmatpush.bf16.msra.mxu1 %v385_v17  ;;  %251 = vmatpush.bf16.msra.mxu2 %v525_v23  ;;  %v546_v7 = vld [vmem:[%s734_s6] ss:$0 sm:$0xff] }
  0x11   :  { %264 = vmatpush.bf16.msra.mxu3 %v533_v36  ;;  %345 = vmatpush.bf16.msra.mxu0 %v543_v43 }
  0x13   :  { %414 = vmatmul.msk.bf16.vlgmr.msra.gmra.mxu1 %vm82_vm0, %v27_v22 }
  0x14   :  { %103 = vmatpush.bf16.msrb.mxu1 %v413_v19  ;;  %252 = vmatpush.bf16.msra.mxu2 %v524_v27 }
  0x15   :  { %265 = vmatpush.bf16.msra.mxu3 %v532_v37  ;;  %346 = vmatpush.bf16.msra.mxu0 %v542_v56 }
  0x18   :  { %104 = vmatpush.bf16.msrb.mxu1 %v405_v24  ;;  %253 = vmatpush.bf16.msra.mxu2 %v523_v31 }
  0x19   :  { %266 = vmatpush.bf16.msra.mxu3 %v531_v38  ;;  %347 = vmatpush.bf16.msra.mxu0 %v541_v57 }
  0x1c   :  { %105 = vmatpush.bf16.msrb.mxu1 %v397_v28  ;;  %254 = vmatpush.bf16.msra.mxu2 %v522_v33 }
  0x1d   :  { %267 = vmatpush.bf16.msra.mxu3 %v530_v39  ;;  %348 = vmatpush.bf16.msra.mxu0 %v540_v58 }
  0x20   :  { %106 = vmatpush.bf16.msrb.mxu1 %v389_v32  ;;  %255 = vmatpush.bf16.msra.mxu2 %v521_v35 }
  0x21   :  { %268 = vmatpush.bf16.msra.mxu3 %v529_v40  ;;  %349 = vmatpush.bf16.msra.mxu0 %v539_v59 }
  0x23   :  { %415 = vmatmul.msk.bf16.vlgmr.msrb.gmra.mxu1 %vm82_vm0, %v27_v22 }
  0x25   :  { %350 = vmatpush.bf16.msra.mxu0 %v538_v60 }
  0x29   :  { %351 = vmatpush.bf16.msra.mxu0 %v537_v61 }
  0x90   :  { %v95_v45 = vpop.f32.mrf.mxu1 }
  0x91   :  { %v96_v46 = vadd.f32 %v95_v45, %v38_v44 }
  0x93   :  { %v112_v47 = vmax.f32 %v96_v46, 0.0 }
  0x95   :  { %v114_v48 = vpack.c.bf16 %v112_v47, %v112_v47 }
  0x97   :  { %256 = vmatmul.bf16.vlgmr.msra.gmra.mxu2 %v114_v48 }
  0x98   :  { %v97_v49 = vpop.f32.mrf.mxu1 }
  0xa0   :  { %v108_v51 = vpop.f32.mrf.mxu1 }
  0xa1   :  { %v109_v52 = vadd.f32 %v108_v51, %v39_v50 }
  0xa3   :  { %v113_v53 = vmax.f32 %v109_v52, 0.0 }
  0xa5   :  { %v115_v54 = vpack.c.bf16 %v113_v53, %v113_v53 }
  0xa7   :  { %269 = vmatmul.bf16.vlgmr.msra.gmra.mxu3 %v115_v54 }
  0xa8   :  { %v110_v55 = vpop.f32.mrf.mxu1 }
 0x11a   :  { %v257_v62 = vpop.f32.mrf.mxu2 }
 0x11b   :  { %v258_v1 = vadd.f32 %v545_v0, %v257_v62 }
 0x122   :  { %v259_v63 = vpop.f32.mrf.mxu2 }
 0x12a   :  { %v270_v2 = vpop.f32.mrf.mxu3 }
 0x12b   :  { %v271_v3 = vadd.f32 %v270_v2, %v258_v1 }
 0x12d   :  { %v274_v4 = vmax.f32 %v271_v3, 0.0 }
 0x12f   :  { %v275_v5 = vpack.c.bf16 %v274_v4, %v274_v4 }
 0x131   :  { %352 = vmatmul.bf16.vlgmr.msra.gmra.mxu0 %v275_v5 }
 0x132   :  { %v272_v6 = vpop.f32.mrf.mxu3 }
 0x1ae   :  { %v353_v8 = vpop.f32.mrf.mxu0 }
 0x1af   :  { %v354_v9 = vadd.f32 %v546_v7, %v353_v8 }
 0x1b1   :  { %v512_v10 = vmul.f32 -1.442695, %v354_v9 }
 0x1b3   :  { %547 = vpow2.f32 %v512_v10 }
 0x1b6   :  { %v355_v11 = vpop.f32.mrf.mxu0 }
 0x1b9   :  { %v548_v12 = vpop.eup %547 }
 0x1ba   :  { %v360_v13 = vadd.f32 1.0, %v548_v12 }
 0x1bc   :  { %549 = vrcp.f32 %v360_v13  ;;  %v372_v17 = vand.u32 2147483648, %v360_v13  ;;  %v370_v19 = vand.u32 2147483647, %v360_v13  ;;  %vm366_vm2 = vweird.f32 %v360_v13 }
 0x1be   :  { %v373_v21 = vor.u32 1.1754944e-38, %v372_v17  ;;  %vm371_vm4 = vcmp.eq.f32.partialorder %v370_v19, 8.507059e+37 }
 0x1c2   :  { %v550_v14 = vpop.eup %549 }
 0x1c3   :  { %v362_v15 = vmul.f32 %v550_v14, %v360_v13  ;;  %vm367_vm1 = vweird.f32 %v550_v14 }
 0x1c4   :  { %vm368_vm3 = vmor %vm366_vm2, %vm367_vm1 }
 0x1c5   :  { %v363_v16 = vsub.f32 1.0, %v362_v15 }
 0x1c7   :  { %v364_v18 = vmul.f32 %v550_v14, %v363_v16 }
 0x1c9   :  { %v365_v20 = vadd.f32 %v550_v14, %v364_v18 }
 0x1cb   :  { %v369_v22 = vsel %vm368_vm3, %v550_v14, %v365_v20 }
 0x1cc   :  { %v374_v23 = vsel %vm371_vm4, %v373_v21, %v369_v22 }
 0x1cd   :  { %v376_v24 = vpack.c.bf16 %v374_v23, %v374_v23 }
 0x1cf   :  { %377 = vst [vmem:[%s735_s7] sm:$0xf] %v376_v24 }

</bundles_post_ra>
